<compile_context>
chip_gen: v5e
topology: v5e:2x2
jax: 0.10.0
libtpu: 0.0.40
codegen_flags: <defaults>
</compile_context>

<pallas_src>
import jax
import jax.numpy as jnp
from jax.experimental import pallas as pl
from jax.experimental.pallas import tpu as pltpu


def ff_kernel(x_ref, w1_ref, b1_ref, w2_ref, b2_ref, o_ref):
    # x_ref:(tm, K1) orig dtype, w1_ref:(K1, H) bf16, b1_ref:(1, H) f32,
    # w2_ref:(H, K2) bf16, b2_ref:(1, K2) f32, o_ref:(tm, K2) orig dtype.
    x = x_ref[...].astype(w1_ref.dtype)                      # cast in-kernel
    h = jnp.dot(x, w1_ref[...],
                preferred_element_type=jnp.float32) + b1_ref[...]
    h = jnp.maximum(h, 0.0)                                  # nn.ReLU (f32)
    y = jnp.dot(h.astype(w2_ref.dtype), w2_ref[...],
                preferred_element_type=jnp.float32) + b2_ref[...]
    o_ref[...] = y.astype(o_ref.dtype)                       # act_fn = identity


def _round_up(a, b):
    return (a + b - 1) // b * b


def _block_diag(w, f):
    """(K, N) -> (f*K, f*N) block-diagonal with f copies of w on the diagonal."""
    k, n = w.shape
    eye = jnp.eye(f, dtype=w.dtype)
    return (eye[:, None, :, None] * w[None, :, None, :]).reshape(f * k, f * n)


def _run_ff(xk, w1k, b1k, w2k, b2k, rm, grid_len, out_dtype):
    m_rows, k_in = xk.shape
    k_hid = w1k.shape[1]
    k_out = w2k.shape[1]
    return pl.pallas_call(
        ff_kernel,
        out_shape=jax.ShapeDtypeStruct((m_rows, k_out), out_dtype),
        grid_spec=pltpu.PrefetchScalarGridSpec(
            num_scalar_prefetch=0,
            grid=(grid_len,),
            in_specs=[
                pl.BlockSpec((rm, k_in), lambda i: (i, 0)),
                pl.BlockSpec((k_in, k_hid), lambda i: (0, 0)),
                pl.BlockSpec((1, k_hid), lambda i: (0, 0)),
                pl.BlockSpec((k_hid, k_out), lambda i: (0, 0)),
                pl.BlockSpec((1, k_out), lambda i: (0, 0)),
            ],
            out_specs=pl.BlockSpec((rm, k_out), lambda i: (i, 0)),
        ),
        compiler_params=pltpu.CompilerParams(
            dimension_semantics=("parallel",),
            vmem_limit_bytes=48 * 1024 * 1024),
    )(xk, w1k, b1k, w2k, b2k)


def _row_tile(rows, want):
    """Pick a row tile: multiple of 8 (sublane-aligned) or the full row count."""
    rm = min(_round_up(want, 8), _round_up(rows, 8))
    if rm >= rows:
        rm = rows                     # single block == full array (always legal)
    return rm


def ff_forward(x, w1_t, b1, w2_t, b2, *, tm=512, compute_dtype=jnp.bfloat16):
    """x: (..., C_in) -> (..., C_out). Weights pre-transposed: (in, out)."""
    orig_shape = x.shape
    c_in = orig_shape[-1]
    if w1_t.shape[0] != c_in:
        raise ValueError(f"w1_t must be (in, hidden); got {w1_t.shape}")
    c_hid = w1_t.shape[1]
    if w2_t.shape[0] != c_hid:
        raise ValueError(f"w2_t must be (hidden, out); got {w2_t.shape}")
    c_out = w2_t.shape[1]

    x2d = x.reshape(-1, c_in)
    m = x2d.shape[0]
    out_dtype = x.dtype

    b1f = b1.astype(jnp.float32)
    b2f = b2.astype(jnp.float32)

    # Lane-dense path: fold 8 rows into the lane axis (free row-major reshape
    # on the HBM layout) + block-diagonal weights; only worthwhile for small
    # feature dims where the output would otherwise be a masked <128-lane store.
    fold = 8
    use_fold = (c_out < 128 and fold * c_in <= 2048 and fold * c_hid <= 4096)

    if use_fold:
        m_pad = _round_up(m, fold)             # only pad to the fold factor
        if m_pad != m:
            x2d = jnp.pad(x2d, ((0, m_pad - m), (0, 0)))
        rows = m_pad // fold                   # rows of the folded array
        rm = _row_tile(rows, _round_up(tm, 8 * fold) // fold)
        grid_len = pl.cdiv(rows, rm)
        xk = x2d.reshape(rows, fold * c_in)    # original dtype; cast in-kernel
        w1k = _block_diag(w1_t.astype(compute_dtype), fold)
        w2k = _block_diag(w2_t.astype(compute_dtype), fold)
        b1k = jnp.tile(b1f, fold).reshape(1, fold * c_hid)
        b2k = jnp.tile(b2f, fold).reshape(1, fold * c_out)
        out = _run_ff(xk, w1k, b1k, w2k, b2k, rm, grid_len, out_dtype)
        out2d = out.reshape(m_pad, c_out)[:m]
    else:
        # TODO(synk): for very large c_in/c_hid (weights not VMEM-resident,
        # esp. v7x 64 MiB), add K/N grid axes with a pl.when-init f32 VMEM
        # accumulator instead of whole-weight residency.
        rows = m
        rm = _row_tile(rows, tm)
        grid_len = pl.cdiv(rows, rm)
        out2d = _run_ff(x2d,
                        w1_t.astype(compute_dtype), b1f.reshape(1, c_hid),
                        w2_t.astype(compute_dtype), b2f.reshape(1, c_out),
                        rm, grid_len, out_dtype)

    return out2d.reshape(*orig_shape[:-1], c_out)


def init_ff_params(key, input_channel, output_channel, hidden_channel=None,
                   dtype=jnp.float32):
    """Deterministic init mirroring nn.Linear's uniform(-1/sqrt(in), 1/sqrt(in))."""
    if hidden_channel is None:
        hidden_channel = input_channel * 2
    k1, k2, k3, k4 = jax.random.split(key, 4)
    bound1 = 1.0 / (input_channel ** 0.5)
    bound2 = 1.0 / (hidden_channel ** 0.5)
    # Stored pre-transposed: (in, out)
    w1_t = jax.random.uniform(k1, (input_channel, hidden_channel), dtype,
                              minval=-bound1, maxval=bound1)
    b1 = jax.random.uniform(k2, (hidden_channel,), dtype,
                            minval=-bound1, maxval=bound1)
    w2_t = jax.random.uniform(k3, (hidden_channel, output_channel), dtype,
                              minval=-bound2, maxval=bound2)
    b2 = jax.random.uniform(k4, (output_channel,), dtype,
                            minval=-bound2, maxval=bound2)
    return w1_t, b1, w2_t, b2


if __name__ == "__main__":
    key = jax.random.PRNGKey(0)
    kx, kp, kx2 = jax.random.split(key, 3)

    # Case 1: small shapes consistent with the module.
    batch, seq, input_channel = 2, 8, 32
    output_channel = 16
    hidden_channel = input_channel * 2  # FF default

    x = jax.random.normal(kx, (batch, seq, input_channel), dtype=jnp.float32)
    w1_t, b1, w2_t, b2 = init_ff_params(kp, input_channel, output_channel,
                                        hidden_channel)

    out = jax.block_until_ready(ff_forward(x, w1_t, b1, w2_t, b2))
    ref = jnp.maximum(x @ w1_t + b1, 0.0) @ w2_t + b2
    assert out.shape == (batch, seq, output_channel)
    assert jnp.allclose(out, ref, atol=3e-2, rtol=3e-2), \
        float(jnp.max(jnp.abs(out - ref)))

    # Case 2: ragged row count + multi-step grid (exercises fold pad / ragged
    # boundary blocks).
    x2 = jax.random.normal(kx2, (5, 123, input_channel), dtype=jnp.float32)
    out2 = jax.block_until_ready(ff_forward(x2, w1_t, b1, w2_t, b2))
    ref2 = jnp.maximum(x2 @ w1_t + b1, 0.0) @ w2_t + b2
    assert out2.shape == (5, 123, output_channel)
    assert jnp.allclose(out2, ref2, atol=3e-2, rtol=3e-2), \
        float(jnp.max(jnp.abs(out2 - ref2)))

    print("KERNEL_OK")
</pallas_src>

<mosaic_0001>
module attributes {stable_mosaic.version = 11 : i64} {
  func.func @ff_kernel(%arg0: i32, %arg1: memref<2x256xf32, #tpu.memory_space<vmem>>, %arg2: memref<256x512xbf16, #tpu.memory_space<vmem>>, %arg3: memref<1x512xf32, #tpu.memory_space<vmem>>, %arg4: memref<512x128xbf16, #tpu.memory_space<vmem>>, %arg5: memref<1x128xf32, #tpu.memory_space<vmem>>, %arg6: memref<2x128xf32, #tpu.memory_space<vmem>>) attributes {dimension_semantics = [#tpu.dimension_semantics<parallel>], iteration_bounds = array<i64: 1>, scalar_prefetch = 0 : i64, scratch_operands = 0 : i64, tpu.core_type = #tpu.core_type<tc>, window_params = [{transform_indices = @transform_0, window_bounds = array<i64: 2, 256>}, {pipeline_mode = #tpu.pipeline_mode<synchronous>, transform_indices = @transform_1, window_bounds = array<i64: 256, 512>}, {pipeline_mode = #tpu.pipeline_mode<synchronous>, transform_indices = @transform_2, window_bounds = array<i64: 1, 512>}, {pipeline_mode = #tpu.pipeline_mode<synchronous>, transform_indices = @transform_3, window_bounds = array<i64: 512, 128>}, {pipeline_mode = #tpu.pipeline_mode<synchronous>, transform_indices = @transform_4, window_bounds = array<i64: 1, 128>}, {transform_indices = @transform_5, window_bounds = array<i64: 2, 128>}]} {
    %c0 = arith.constant 0 : index
    %c0_0 = arith.constant 0 : index
    %0 = vector.load %arg1[%c0, %c0_0] : memref<2x256xf32, #tpu.memory_space<vmem>>, vector<2x256xf32>
    %1 = arith.truncf %0 : vector<2x256xf32> to vector<2x256xbf16>
    %c0_1 = arith.constant 0 : index
    %c0_2 = arith.constant 0 : index
    %2 = vector.load %arg2[%c0_1, %c0_2] : memref<256x512xbf16, #tpu.memory_space<vmem>>, vector<256x512xbf16>
    %cst = arith.constant dense<0.000000e+00> : vector<2x512xf32>
    %3 = tpu.matmul %1, %2, %cst {dimension_numbers = #tpu.dot_dimension_numbers<[1], [0], [0], [1], [0, 0, 1, 1], [], []>} : vector<2x256xbf16>, vector<256x512xbf16>, vector<2x512xf32> -> vector<2x512xf32>
    %c0_3 = arith.constant 0 : index
    %c0_4 = arith.constant 0 : index
    %4 = vector.load %arg3[%c0_3, %c0_4] : memref<1x512xf32, #tpu.memory_space<vmem>>, vector<1x512xf32>
    %5 = vector.broadcast %4 : vector<1x512xf32> to vector<2x512xf32>
    %6 = arith.addf %3, %5 : vector<2x512xf32>
    %cst_5 = arith.constant 0.000000e+00 : f32
    %7 = vector.broadcast %cst_5 : f32 to vector<2x512xf32>
    %8 = arith.maximumf %6, %7 : vector<2x512xf32>
    %9 = arith.truncf %8 : vector<2x512xf32> to vector<2x512xbf16>
    %c0_6 = arith.constant 0 : index
    %c0_7 = arith.constant 0 : index
    %10 = vector.load %arg4[%c0_6, %c0_7] : memref<512x128xbf16, #tpu.memory_space<vmem>>, vector<512x128xbf16>
    %cst_8 = arith.constant dense<0.000000e+00> : vector<2x128xf32>
    %11 = tpu.matmul %9, %10, %cst_8 {dimension_numbers = #tpu.dot_dimension_numbers<[1], [0], [0], [1], [0, 0, 1, 1], [], []>} : vector<2x512xbf16>, vector<512x128xbf16>, vector<2x128xf32> -> vector<2x128xf32>
    %c0_9 = arith.constant 0 : index
    %c0_10 = arith.constant 0 : index
    %12 = vector.load %arg5[%c0_9, %c0_10] : memref<1x128xf32, #tpu.memory_space<vmem>>, vector<1x128xf32>
    %13 = vector.broadcast %12 : vector<1x128xf32> to vector<2x128xf32>
    %14 = arith.addf %11, %13 : vector<2x128xf32>
    %c0_11 = arith.constant 0 : index
    %c0_12 = arith.constant 0 : index
    %15 = vector.load %arg6[%c0_11, %c0_12] : memref<2x128xf32, #tpu.memory_space<vmem>>, vector<2x128xf32>
    tpu.vector_store %arg6[%c0_11, %c0_12], %14 {strides = array<i32>} : memref<2x128xf32, #tpu.memory_space<vmem>>, vector<2x128xf32>,
    return
  }
  func.func @transform_0(%arg0: i32) -> (i32, i32) {
    %c0_i32 = arith.constant 0 : i32
    %c0_i32_0 = arith.constant 0 : i32
    return %arg0, %c0_i32 : i32, i32
  }
  func.func @transform_1(%arg0: i32) -> (i32, i32) {
    %c0_i32 = arith.constant 0 : i32
    %c0_i32_0 = arith.constant 0 : i32
    %c0_i32_1 = arith.constant 0 : i32
    return %c0_i32, %c0_i32_0 : i32, i32
  }
  func.func @transform_2(%arg0: i32) -> (i32, i32) {
    %c0_i32 = arith.constant 0 : i32
    %c0_i32_0 = arith.constant 0 : i32
    %c0_i32_1 = arith.constant 0 : i32
    return %c0_i32, %c0_i32_0 : i32, i32
  }
  func.func @transform_3(%arg0: i32) -> (i32, i32) {
    %c0_i32 = arith.constant 0 : i32
    %c0_i32_0 = arith.constant 0 : i32
    %c0_i32_1 = arith.constant 0 : i32
    return %c0_i32, %c0_i32_0 : i32, i32
  }
  func.func @transform_4(%arg0: i32) -> (i32, i32) {
    %c0_i32 = arith.constant 0 : i32
    %c0_i32_0 = arith.constant 0 : i32
    %c0_i32_1 = arith.constant 0 : i32
    return %c0_i32, %c0_i32_0 : i32, i32
  }
  func.func @transform_5(%arg0: i32) -> (i32, i32) {
    %c0_i32 = arith.constant 0 : i32
    %c0_i32_0 = arith.constant 0 : i32
    return %arg0, %c0_i32 : i32, i32
  }
}

</mosaic_0001>

<bundles_post_ra>
// kernel: tpu_custom_call.1
= control target key start
LH: loop header
LB: loop body
LE: loop exit
PB: predicated region body
PF: predicated region fallthrough
CT: control target
= control target key end

     0   :  { %10 = vsyncpa [#allocation3], 0  ;;  %s1614_s0 = inlined_call_operand.hbm [shape: f32[2,256], index: 0, kind: input, shape index: {}]   ;;  %s1615_s1 = inlined_call_operand.hbm [shape: bf16[256,512], index: 1, kind: input, shape index: {}]   ;;  %s1616_s2 = inlined_call_operand.hbm [shape: f32[1,512], index: 2, kind: input, shape index: {}]   ;;  %s1617_s3 = inlined_call_operand.hbm [shape: bf16[512,128], index: 3, kind: input, shape index: {}]   ;;  %s1618_s4 = inlined_call_operand.vmem [shape: f32[1,128], index: 4, kind: input, shape index: {}]   ;;  %s1619_s5 = inlined_call_operand.hbm [shape: f32[2,128], index: 5, kind: output, shape index: {}]  }
   0x1   :  { %11 = vsyncpa [#allocation6], 0 }
   0x2   :  { %12 = vsyncpa [#allocation9], 0  ;;  %s29_s20 = sshll.u32 %s1615_s1, 4  ;;  %s30_s20 = int_to_ptr.hbm [resolvable:$true] %s29_s20 }
   0x3   :  { %13 = vsyncpa [#allocation4], 0  ;;  %s1545_s21 = smov [#allocation5]   ;;  %s19_s25 = sshll.u32 %s1614_s0, 4  ;;  %s20_s25 = int_to_ptr.hbm [resolvable:$true] %s19_s25 }
   0x4   :  { %s31_s22 = sshll.u32 %s1545_s21, 4  ;;  %s1546_s26 = smov 256   ;;  %s32_s22 = int_to_ptr.vmem [resolvable:$true] %s31_s22 }
   0x5   :  { %s1547_s27 = smov 16   ;;  %s1548_s28 = smov [#allocation2]  }
   0x6   :  { %37 = dma.hbm_to_vmem [thread:$0]  %s30_s20, 8192, %s32_s22, [#allocation6], %s1546_s26, %s1546_s26, %s1547_s27  }
   0x7   :  { %s21_s29 = sshll.u32 %s1548_s28, 4  ;;  %s43_s7 = sshll.u32 %s1616_s2, 4  ;;  %s22_s29 = int_to_ptr.vmem [resolvable:$true] %s21_s29  ;;  %s44_s7 = int_to_ptr.hbm [resolvable:$true] %s43_s7 }
   0x8   :  { %24 = dma.hbm_to_vmem [thread:$0]  %s20_s25, 64, %s22_s29, [#allocation3]  }
   0x9   :  { %s53_s9 = sshll.u32 %s1617_s3, 4  ;;  %s1549_s10 = smov [#allocation7]   ;;  %s54_s9 = int_to_ptr.hbm [resolvable:$true] %s53_s9 }
   0xa   :  { %s45_s11 = sshll.u32 %s1549_s10, 4  ;;  %s1550_s0 = smov [#allocation8]   ;;  %s46_s11 = int_to_ptr.vmem [resolvable:$true] %s45_s11 }
   0xb   :  { %48 = dma.hbm_to_vmem [thread:$0]  %s44_s7, 64, %s46_s11, [#allocation6]  }
   0xc   :  { %s55_s12 = sshll.u32 %s1550_s0, 4  ;;  %s1551_s13 = smov 64   ;;  %s56_s12 = int_to_ptr.vmem [resolvable:$true] %s55_s12 }
   0xd   :  { %s1552_s14 = smov 4  }
   0xe   :  { %61 = dma.hbm_to_vmem [thread:$0]  %s54_s9, 4096, %s56_s12, [#allocation9], %s1551_s13, %s1551_s13, %s1552_s14  }
   0xf   :  { %1537 = dma.done.wait [#allocation3], 64  }
  0x10   :  { %1538 = vsyncadd [#allocation3], 4294967232 }
  0x11   :  { %1539 = dma.done.wait [#allocation6], 8256  }
  0x12   :  { %1540 = vsyncadd [#allocation6], 4294959040 }
  0x13   :  { %1541 = dma.done.wait [#allocation9], 4096  }
  0x14   :  { %1542 = vsyncadd [#allocation9], 4294963200  ;;  %v1041_v0 = vld [vmem:[#allocation5 + $0xe0] sm:$0xf]  ;;  %v1341_v1 = vld [vmem:[#allocation5 + $0xec] sm:$0xf0] }
  0x15   :  { %v1169_v2 = vld [vmem:[#allocation5 + $0x1e0] sm:$0xf]  ;;  %v1042_v3 = vor.u32 %v1341_v1, %v1041_v0  ;;  %v1373_v4 = vld [vmem:[#allocation5 + $0x1ec] sm:$0xf0]  ;;  %v1339_v5 = vld [vmem:[#allocation5 + $0xe4] sm:$0xf] }
  0x16   :  { %v1043_v6 = vld [vmem:[#allocation5 + $0xf0] sm:$0xf0]  ;;  %v1170_v7 = vor.u32 %v1373_v4, %v1169_v2  ;;  %v1371_v9 = vld [vmem:[#allocation5 + $0x1e4] sm:$0xf]  ;;  %v1025_v11 = vld [vmem:[#allocation5 + $0xc0] sm:$0xf] }
  0x17   :  { %v1046_v8 = vor.u32 %v1339_v5, %v1043_v6  ;;  %v1171_v10 = vld [vmem:[#allocation5 + $0x1f0] sm:$0xf0]  ;;  %483 = vmatpush.bf16.msra.mxu0 %v1042_v3  ;;  %v1337_v13 = vld [vmem:[#allocation5 + $0xcc] sm:$0xf0]  ;;  %v1153_v14 = vld [vmem:[#allocation5 + $0x1c0] sm:$0xf] }
  0x18   :  { %v1174_v12 = vor.u32 %v1371_v9, %v1171_v10  ;;  %v1369_v15 = vld [vmem:[#allocation5 + $0x1cc] sm:$0xf0]  ;;  %496 = vmatpush.bf16.msra.mxu1 %v1170_v7  ;;  %v1026_v16 = vor.u32 %v1337_v13, %v1025_v11  ;;  %v1335_v18 = vld [vmem:[#allocation5 + $0xc4] sm:$0xf]  ;;  %v1027_v19 = vld [vmem:[#allocation5 + $0xd0] sm:$0xf0] }
  0x19   :  { %509 = vmatpush.bf16.msra.mxu2 %v1046_v8  ;;  %v1154_v17 = vor.u32 %v1369_v15, %v1153_v14  ;;  %v1367_v20 = vld [vmem:[#allocation5 + $0x1c4] sm:$0xf]  ;;  %v1030_v21 = vor.u32 %v1335_v18, %v1027_v19  ;;  %v1155_v22 = vld [vmem:[#allocation5 + $0x1d0] sm:$0xf0]  ;;  %v1009_v23 = vld [vmem:[#allocation5 + $0xa0] sm:$0xf] }
  0x1a   :  { %522 = vmatpush.bf16.msra.mxu3 %v1174_v12  ;;  %v1333_v24 = vld [vmem:[#allocation5 + $0xac] sm:$0xf0]  ;;  %v1158_v25 = vor.u32 %v1367_v20, %v1155_v22  ;;  %v1137_v26 = vld [vmem:[#allocation5 + $0x1a0] sm:$0xf]  ;;  %v1331_v28 = vld [vmem:[#allocation5 + $0xa4] sm:$0xf] }
  0x1b   :  { %v1365_v27 = vld [vmem:[#allocation5 + $0x1ac] sm:$0xf0]  ;;  %484 = vmatpush.bf16.msra.mxu0 %v1026_v16  ;;  %v1010_v29 = vor.u32 %v1333_v24, %v1009_v23  ;;  %v1011_v30 = vld [vmem:[#allocation5 + $0xb0] sm:$0xf0]  ;;  %v1363_v31 = vld [vmem:[#allocation5 + $0x1a4] sm:$0xf] }
  0x1c   :  { %v1139_v32 = vld [vmem:[#allocation5 + $0x1b0] sm:$0xf0]  ;;  %497 = vmatpush.bf16.msra.mxu1 %v1154_v17  ;;  %v1138_v33 = vor.u32 %v1365_v27, %v1137_v26  ;;  %v1014_v34 = vor.u32 %v1331_v28, %v1011_v30  ;;  %v993_v35 = vld [vmem:[#allocation5 + $0x80] sm:$0xf]  ;;  %v1329_v36 = vld [vmem:[#allocation5 + $0x8c] sm:$0xf0] }
  0x1d   :  { %510 = vmatpush.bf16.msra.mxu2 %v1030_v21  ;;  %v1121_v37 = vld [vmem:[#allocation5 + $0x180] sm:$0xf]  ;;  %v1142_v38 = vor.u32 %v1363_v31, %v1139_v32  ;;  %v1361_v39 = vld [vmem:[#allocation5 + $0x18c] sm:$0xf0]  ;;  %v1327_v40 = vld [vmem:[#allocation5 + $0x84] sm:$0xf]  ;;  %v994_v44 = vor.u32 %v1329_v36, %v993_v35 }
  0x1e   :  { %523 = vmatpush.bf16.msra.mxu3 %v1158_v25  ;;  %v995_v41 = vld [vmem:[#allocation5 + $0x90] sm:$0xf0]  ;;  %v1359_v42 = vld [vmem:[#allocation5 + $0x184] sm:$0xf]  ;;  %v1122_v45 = vor.u32 %v1361_v39, %v1121_v37  ;;  %v977_v47 = vld [vmem:[#allocation5 + $0x60] sm:$0xf] }
  0x1f   :  { %v1123_v43 = vld [vmem:[#allocation5 + $0x190] sm:$0xf0]  ;;  %485 = vmatpush.bf16.msra.mxu0 %v1010_v29  ;;  %v998_v46 = vor.u32 %v1327_v40, %v995_v41  ;;  %v1325_v48 = vld [vmem:[#allocation5 + $0x6c] sm:$0xf0]  ;;  %v1105_v49 = vld [vmem:[#allocation5 + $0x160] sm:$0xf] }
  0x20   :  { %498 = vmatpush.bf16.msra.mxu1 %v1138_v33  ;;  %v1126_v50 = vor.u32 %v1359_v42, %v1123_v43  ;;  %v1357_v51 = vld [vmem:[#allocation5 + $0x16c] sm:$0xf0]  ;;  %v1323_v52 = vld [vmem:[#allocation5 + $0x64] sm:$0xf]  ;;  %v979_v53 = vld [vmem:[#allocation5 + $0x70] sm:$0xf0]  ;;  %v978_v56 = vor.u32 %v1325_v48, %v977_v47 }
  0x21   :  { %511 = vmatpush.bf16.msra.mxu2 %v1014_v34  ;;  %v1355_v54 = vld [vmem:[#allocation5 + $0x164] sm:$0xf]  ;;  %v1107_v55 = vld [vmem:[#allocation5 + $0x170] sm:$0xf0]  ;;  %v1106_v57 = vor.u32 %v1357_v51, %v1105_v49  ;;  %v982_v58 = vor.u32 %v1323_v52, %v979_v53  ;;  %v961_v59 = vld [vmem:[#allocation5 + $0x40] sm:$0xf] }
  0x22   :  { %524 = vmatpush.bf16.msra.mxu3 %v1142_v38  ;;  %v1321_v60 = vld [vmem:[#allocation5 + $0x4c] sm:$0xf0]  ;;  %v1089_v61 = vld [vmem:[#allocation5 + $0x140] sm:$0xf]  ;;  %v1110_v62 = vor.u32 %v1355_v54, %v1107_v55  ;;  %v1319_v0 = vld [vmem:[#allocation5 + $0x44] sm:$0xf] }
  0x23   :  { %486 = vmatpush.bf16.msra.mxu0 %v994_v44  ;;  %v1353_v63 = vld [vmem:[#allocation5 + $0x14c] sm:$0xf0]  ;;  %v963_v1 = vld [vmem:[#allocation5 + $0x50] sm:$0xf0]  ;;  %v1351_v2 = vld [vmem:[#allocation5 + $0x144] sm:$0xf]  ;;  %v962_v4 = vor.u32 %v1321_v60, %v961_v59 }
  0x24   :  { %499 = vmatpush.bf16.msra.mxu1 %v1122_v45  ;;  %v1091_v3 = vld [vmem:[#allocation5 + $0x150] sm:$0xf0]  ;;  %v1090_v5 = vor.u32 %v1353_v63, %v1089_v61  ;;  %v966_v6 = vor.u32 %v1319_v0, %v963_v1  ;;  %v945_v7 = vld [vmem:[#allocation5 + $0x20] sm:$0xf]  ;;  %v1317_v8 = vld [vmem:[#allocation5 + $0x2c] sm:$0xf0] }
  0x25   :  { %512 = vmatpush.bf16.msra.mxu2 %v998_v46  ;;  %v1073_v9 = vld [vmem:[#allocation5 + $0x120] sm:$0xf]  ;;  %v1094_v10 = vor.u32 %v1351_v2, %v1091_v3  ;;  %v1349_v11 = vld [vmem:[#allocation5 + $0x12c] sm:$0xf0]  ;;  %v1315_v12 = vld [vmem:[#allocation5 + $0x24] sm:$0xf]  ;;  %v946_v17 = vor.u32 %v1317_v8, %v945_v7 }
  0x26   :  { %525 = vmatpush.bf16.msra.mxu3 %v1126_v50  ;;  %v947_v13 = vld [vmem:[#allocation5 + $0x30] sm:$0xf0]  ;;  %v1347_v14 = vld [vmem:[#allocation5 + $0x124] sm:$0xf]  ;;  %v929_v16 = vld [vmem:[#allocation5] sm:$0xf]  ;;  %v1074_v21 = vor.u32 %v1349_v11, %v1073_v9 }
  0x27   :  { %487 = vmatpush.bf16.msra.mxu0 %v978_v56  ;;  %v1075_v15 = vld [vmem:[#allocation5 + $0x130] sm:$0xf0]  ;;  %v1313_v18 = vld [vmem:[#allocation5 + $0xc] sm:$0xf0]  ;;  %v1057_v19 = vld [vmem:[#allocation5 + $0x100] sm:$0xf]  ;;  %v950_v22 = vor.u32 %v1315_v12, %v947_v13 }
  0x28   :  { %500 = vmatpush.bf16.msra.mxu1 %v1106_v57  ;;  %v1345_v20 = vld [vmem:[#allocation5 + $0x10c] sm:$0xf0]  ;;  %v1311_v23 = vld [vmem:[#allocation5 + $0x4] sm:$0xf]  ;;  %v931_v24 = vld [vmem:[#allocation5 + $0x10] sm:$0xf0]  ;;  %v1078_v26 = vor.u32 %v1347_v14, %v1075_v15  ;;  %v930_v33 = vor.u32 %v1313_v18, %v929_v16 }
  0x29   :  { %513 = vmatpush.bf16.msra.mxu2 %v982_v58  ;;  %v1343_v25 = vld [vmem:[#allocation5 + $0x104] sm:$0xf]  ;;  %v1059_v27 = vld [vmem:[#allocation5 + $0x110] sm:$0xf0]  ;;  %v1049_v28 = vld [vmem:[#allocation5 + $0xe8] sm:$0xf]  ;;  %v1058_v36 = vor.u32 %v1345_v20, %v1057_v19  ;;  %v934_v37 = vor.u32 %v1311_v23, %v931_v24 }
  0x2a   :  { %526 = vmatpush.bf16.msra.mxu3 %v1110_v62  ;;  %v1342_v29 = vld [vmem:[#allocation5 + $0xf4] sm:$0xf0]  ;;  %v1177_v30 = vld [vmem:[#allocation5 + $0x1e8] sm:$0xf]  ;;  %v80_v32 = vld [vmem:[#allocation2] sm:$0xf]  ;;  %v1062_v40 = vor.u32 %v1343_v25, %v1059_v27 }
  0x2b   :  { %488 = vmatpush.bf16.msra.mxu0 %v962_v4  ;;  %v1374_v31 = vld [vmem:[#allocation5 + $0x1f4] sm:$0xf0]  ;;  %v1340_v34 = vld [vmem:[#allocation5 + $0xec] sm:$0xf]  ;;  %v1051_v35 = vld [vmem:[#allocation5 + $0xf8] sm:$0xf0]  ;;  %v1050_v41 = vor.u32 %v1342_v29, %v1049_v28 }
  0x2c   :  { %501 = vmatpush.bf16.msra.mxu1 %v1090_v5  ;;  %82 = vst [vmem:[#allocation1] ss:$4 sm:$0xff] %v80_v32  ;;  %v1372_v38 = vld [vmem:[#allocation5 + $0x1ec] sm:$0xf]  ;;  %v1179_v39 = vld [vmem:[#allocation5 + $0x1f8] sm:$0xf0]  ;;  %v1178_v42 = vor.u32 %v1374_v31, %v1177_v30  ;;  %v1054_v43 = vor.u32 %v1340_v34, %v1051_v35 }
  0x2d   :  { %514 = vmatpush.bf16.msra.mxu2 %v966_v6  ;;  %v1033_v44 = vld [vmem:[#allocation5 + $0xc8] sm:$0xf]  ;;  %v1338_v45 = vld [vmem:[#allocation5 + $0xd4] sm:$0xf0]  ;;  %v1182_v47 = vor.u32 %v1372_v38, %v1179_v39  ;;  %v1336_v49 = vld [vmem:[#allocation5 + $0xcc] sm:$0xf] }
  0x2e   :  { %527 = vmatpush.bf16.msra.mxu3 %v1094_v10  ;;  %v1161_v46 = vld [vmem:[#allocation5 + $0x1c8] sm:$0xf]  ;;  %v1370_v48 = vld [vmem:[#allocation5 + $0x1d4] sm:$0xf0]  ;;  %v1035_v50 = vld [vmem:[#allocation5 + $0xd8] sm:$0xf0]  ;;  %v1034_v53 = vor.u32 %v1338_v45, %v1033_v44 }
  0x2f   :  { %489 = vmatpush.bf16.msra.mxu0 %v946_v17  ;;  %v1368_v51 = vld [vmem:[#allocation5 + $0x1cc] sm:$0xf]  ;;  %v1163_v52 = vld [vmem:[#allocation5 + $0x1d8] sm:$0xf0]  ;;  %v1017_v54 = vld [vmem:[#allocation5 + $0xa8] sm:$0xf]  ;;  %v1162_v57 = vor.u32 %v1370_v48, %v1161_v46  ;;  %v1038_v58 = vor.u32 %v1336_v49, %v1035_v50 }
  0x30   :  { %502 = vmatpush.bf16.msra.mxu1 %v1074_v21  ;;  %v1334_v55 = vld [vmem:[#allocation5 + $0xb4] sm:$0xf0]  ;;  %v1145_v56 = vld [vmem:[#allocation5 + $0x1a8] sm:$0xf]  ;;  %v1166_v61 = vor.u32 %v1368_v51, %v1163_v52  ;;  %v1332_v0 = vld [vmem:[#allocation5 + $0xac] sm:$0xf] }
  0x31   :  { %515 = vmatpush.bf16.msra.mxu2 %v950_v22  ;;  %v1366_v63 = vld [vmem:[#allocation5 + $0x1b4] sm:$0xf0]  ;;  %v1019_v1 = vld [vmem:[#allocation5 + $0xb8] sm:$0xf0]  ;;  %v1364_v2 = vld [vmem:[#allocation5 + $0x1ac] sm:$0xf]  ;;  %v1018_v5 = vor.u32 %v1334_v55, %v1017_v54 }
  0x32   :  { %528 = vmatpush.bf16.msra.mxu3 %v1078_v26  ;;  %v1147_v3 = vld [vmem:[#allocation5 + $0x1b8] sm:$0xf0]  ;;  %v1146_v6 = vor.u32 %v1366_v63, %v1145_v56  ;;  %v1022_v7 = vor.u32 %v1332_v0, %v1019_v1  ;;  %v1001_v8 = vld [vmem:[#allocation5 + $0x88] sm:$0xf]  ;;  %v1330_v9 = vld [vmem:[#allocation5 + $0x94] sm:$0xf0] }
  0x33   :  { %490 = vmatpush.bf16.msra.mxu0 %v930_v33  ;;  %v83_v59 = vld.sshfl [vmem:[#allocation1] sm:$0xff pattern:$0x73625140]  ;;  %v84_v60 = vld.sshfl [vmem:[#allocation1 + $0x8] sm:$0xff pattern:$0x73625140]  ;;  %v1150_v11 = vor.u32 %v1364_v2, %v1147_v3  ;;  %v1002_v17 = vor.u32 %v1330_v9, %v1001_v8 }
  0x34   :  { %503 = vmatpush.bf16.msra.mxu1 %v1058_v36  ;;  %v1596_v62 = vpack.c.bf16 %v83_v59, %v83_v59  ;;  %v1598_v4 = vpack.c.bf16 %v84_v60, %v84_v60  ;;  %v1129_v10 = vld [vmem:[#allocation5 + $0x188] sm:$0xf]  ;;  %v1362_v12 = vld [vmem:[#allocation5 + $0x194] sm:$0xf0]  ;;  %v1328_v13 = vld [vmem:[#allocation5 + $0x8c] sm:$0xf] }
  0x35   :  { %516 = vmatpush.bf16.msra.mxu2 %v934_v37  ;;  %v1003_v14 = vld [vmem:[#allocation5 + $0x98] sm:$0xf0]  ;;  %v1360_v15 = vld [vmem:[#allocation5 + $0x18c] sm:$0xf]  ;;  %v1130_v18 = vor.u32 %v1362_v12, %v1129_v10  ;;  %v985_v20 = vld [vmem:[#allocation5 + $0x68] sm:$0xf] }
  0x36   :  { %529 = vmatpush.bf16.msra.mxu3 %v1062_v40  ;;  %491 = vmatmul.bf16.vlgmr.msra.gmra.mxu0 %v1596_v62  ;;  %v1131_v16 = vld [vmem:[#allocation5 + $0x198] sm:$0xf0]  ;;  %v1006_v19 = vor.u32 %v1328_v13, %v1003_v14  ;;  %v1326_v21 = vld [vmem:[#allocation5 + $0x74] sm:$0xf0]  ;;  %v1113_v22 = vld [vmem:[#allocation5 + $0x168] sm:$0xf] }
  0x37   :  { %535 = vmatpush.bf16.msrb.mxu0 %v1050_v41  ;;  %504 = vmatmul.bf16.vlgmr.msra.gmra.mxu1 %v1598_v4  ;;  %v1134_v23 = vor.u32 %v1360_v15, %v1131_v16  ;;  %v1358_v24 = vld [vmem:[#allocation5 + $0x174] sm:$0xf0]  ;;  %v1324_v25 = vld [vmem:[#allocation5 + $0x6c] sm:$0xf]  ;;  %v987_v26 = vld [vmem:[#allocation5 + $0x78] sm:$0xf0]  ;;  %v986_v29 = vor.u32 %v1326_v21, %v985_v20 }
  0x38   :  { %548 = vmatpush.bf16.msrb.mxu1 %v1178_v42  ;;  %517 = vmatmul.bf16.vlgmr.msra.gmra.mxu2 %v1596_v62  ;;  %v1356_v27 = vld [vmem:[#allocation5 + $0x16c] sm:$0xf]  ;;  %v1115_v28 = vld [vmem:[#allocation5 + $0x178] sm:$0xf0]  ;;  %v969_v30 = vld [vmem:[#allocation5 + $0x48] sm:$0xf]  ;;  %v1114_v31 = vor.u32 %v1358_v24, %v1113_v22  ;;  %v990_v32 = vor.u32 %v1324_v25, %v987_v26 }
  0x39   :  { %561 = vmatpush.bf16.msrb.mxu2 %v1054_v43  ;;  %530 = vmatmul.bf16.vlgmr.msra.gmra.mxu3 %v1598_v4  ;;  %v1322_v33 = vld [vmem:[#allocation5 + $0x54] sm:$0xf0]  ;;  %v1097_v34 = vld [vmem:[#allocation5 + $0x148] sm:$0xf]  ;;  %v1118_v36 = vor.u32 %v1356_v27, %v1115_v28  ;;  %v1320_v37 = vld [vmem:[#allocation5 + $0x4c] sm:$0xf] }
  0x3a   :  { %574 = vmatpush.bf16.msrb.mxu3 %v1182_v47  ;;  %v1354_v35 = vld [vmem:[#allocation5 + $0x154] sm:$0xf0]  ;;  %v971_v38 = vld [vmem:[#allocation5 + $0x58] sm:$0xf0]  ;;  %v1352_v39 = vld [vmem:[#allocation5 + $0x14c] sm:$0xf]  ;;  %v970_v41 = vor.u32 %v1322_v33, %v969_v30 }
  0x3b   :  { %536 = vmatpush.bf16.msrb.mxu0 %v1034_v53  ;;  %v1099_v40 = vld [vmem:[#allocation5 + $0x158] sm:$0xf0]  ;;  %v1098_v42 = vor.u32 %v1354_v35, %v1097_v34  ;;  %v974_v43 = vor.u32 %v1320_v37, %v971_v38  ;;  %v953_v44 = vld [vmem:[#allocation5 + $0x28] sm:$0xf]  ;;  %v1318_v45 = vld [vmem:[#allocation5 + $0x34] sm:$0xf0] }
  0x3c   :  { %549 = vmatpush.bf16.msrb.mxu1 %v1162_v57  ;;  %v1081_v46 = vld [vmem:[#allocation5 + $0x128] sm:$0xf]  ;;  %v1102_v47 = vor.u32 %v1352_v39, %v1099_v40  ;;  %v1350_v48 = vld [vmem:[#allocation5 + $0x134] sm:$0xf0]  ;;  %v1316_v49 = vld [vmem:[#allocation5 + $0x2c] sm:$0xf]  ;;  %v954_v53 = vor.u32 %v1318_v45, %v953_v44 }
  0x3d   :  { %562 = vmatpush.bf16.msrb.mxu2 %v1038_v58  ;;  %v955_v50 = vld [vmem:[#allocation5 + $0x38] sm:$0xf0]  ;;  %v1348_v51 = vld [vmem:[#allocation5 + $0x12c] sm:$0xf]  ;;  %v1082_v54 = vor.u32 %v1350_v48, %v1081_v46  ;;  %v937_v56 = vld [vmem:[#allocation5 + $0x8] sm:$0xf] }
  0x3e   :  { %575 = vmatpush.bf16.msrb.mxu3 %v1166_v61  ;;  %v1083_v52 = vld [vmem:[#allocation5 + $0x138] sm:$0xf0]  ;;  %v958_v55 = vor.u32 %v1316_v49, %v955_v50  ;;  %v1314_v57 = vld [vmem:[#allocation5 + $0x14] sm:$0xf0]  ;;  %v1065_v58 = vld [vmem:[#allocation5 + $0x108] sm:$0xf] }
  0x3f   :  { %537 = vmatpush.bf16.msrb.mxu0 %v1018_v5  ;;  %v1086_v59 = vor.u32 %v1348_v51, %v1083_v52  ;;  %v1346_v60 = vld [vmem:[#allocation5 + $0x114] sm:$0xf0]  ;;  %v1312_v61 = vld [vmem:[#allocation5 + $0xc] sm:$0xf]  ;;  %v939_v63 = vld [vmem:[#allocation5 + $0x18] sm:$0xf0]  ;;  %v938_v2 = vor.u32 %v1314_v57, %v937_v56 }
  0x40   :  { %550 = vmatpush.bf16.msrb.mxu1 %v1146_v6  ;;  %v1344_v0 = vld [vmem:[#allocation5 + $0x10c] sm:$0xf]  ;;  %v1067_v1 = vld [vmem:[#allocation5 + $0x118] sm:$0xf0]  ;;  %v1066_v3 = vor.u32 %v1346_v60, %v1065_v58  ;;  %v942_v5 = vor.u32 %v1312_v61, %v939_v63  ;;  %v1381_v10 = vld [vmem:[#allocation8 + $0x30] sm:$0xff]  ;;  %s1553_s15 = smov [#allocation10]  }
  0x41   :  { %563 = vmatpush.bf16.msrb.mxu2 %v1022_v7  ;;  %v1070_v6 = vor.u32 %v1344_v0, %v1067_v1  ;;  %v1382_v7 = vld [vmem:[#allocation8 + $0x38] sm:$0xff]  ;;  %v1380_v12 = vld [vmem:[#allocation8 + $0x28] sm:$0xff]  ;;  %v1379_v14 = vld [vmem:[#allocation8 + $0x20] sm:$0xff]  ;;  %s913_s16 = sshll.u32 %s1553_s15, 4  ;;  %s915_s19 = sshll.u32 %s1619_s5, 4  ;;  %s914_s16 = int_to_ptr.vmem [resolvable:$true] %s913_s16  ;;  %s916_s19 = int_to_ptr.hbm [resolvable:$true] %s915_s19 }
  0x42   :  { %576 = vmatpush.bf16.msrb.mxu3 %v1150_v11  ;;  %v1390_v8 = vld [vmem:[#allocation8 + $0x78] sm:$0xff]  ;;  %v1389_v11 = vld [vmem:[#allocation8 + $0x70] sm:$0xff]  ;;  %v1388_v13 = vld [vmem:[#allocation8 + $0x68] sm:$0xff] }
  0x43   :  { %538 = vmatpush.bf16.msrb.mxu0 %v1002_v17  ;;  %v1398_v9 = vld [vmem:[#allocation8 + $0xb8] sm:$0xff]  ;;  %v1387_v15 = vld [vmem:[#allocation8 + $0x60] sm:$0xff]  ;;  %v1384_v20 = vld [vmem:[#allocation8 + $0x48] sm:$0xff] }
  0x44   :  { %551 = vmatpush.bf16.msrb.mxu1 %v1130_v18  ;;  %v1378_v16 = vld [vmem:[#allocation8 + $0x18] sm:$0xff]  ;;  %v1377_v18 = vld [vmem:[#allocation8 + $0x10] sm:$0xff]  ;;  %v1396_v22 = vld [vmem:[#allocation8 + $0xa8] sm:$0xff] }
  0x45   :  { %564 = vmatpush.bf16.msrb.mxu2 %v1006_v19  ;;  %v1386_v17 = vld [vmem:[#allocation8 + $0x58] sm:$0xff]  ;;  %v1385_v19 = vld [vmem:[#allocation8 + $0x50] sm:$0xff]  ;;  %v1383_v24 = vld [vmem:[#allocation8 + $0x40] sm:$0xff] }
  0x46   :  { %577 = vmatpush.bf16.msrb.mxu3 %v1134_v23  ;;  %v1406_v21 = vld [vmem:[#allocation8 + $0xf8] sm:$0xff]  ;;  %v1375_v23 = vld [vmem:[#allocation8] sm:$0xff]  ;;  %v1405_v25 = vld [vmem:[#allocation8 + $0xf0] sm:$0xff] }
  0x47   :  { %539 = vmatpush.bf16.msrb.mxu0 %v986_v29  ;;  %v1395_v26 = vld [vmem:[#allocation8 + $0xa0] sm:$0xff]  ;;  %v1404_v27 = vld [vmem:[#allocation8 + $0xe8] sm:$0xff]  ;;  %v1394_v28 = vld [vmem:[#allocation8 + $0x98] sm:$0xff] }
  0x48   :  { %552 = vmatpush.bf16.msrb.mxu1 %v1114_v31  ;;  %v1403_v29 = vld [vmem:[#allocation8 + $0xe0] sm:$0xff]  ;;  %v1393_v30 = vld [vmem:[#allocation8 + $0x90] sm:$0xff]  ;;  %v1402_v31 = vld [vmem:[#allocation8 + $0xd8] sm:$0xff] }
  0x49   :  { %565 = vmatpush.bf16.msrb.mxu2 %v990_v32  ;;  %v153_v32 = vld [vmem:[#allocation7] sm:$0xf]  ;;  %v1392_v33 = vld [vmem:[#allocation8 + $0x88] sm:$0xff]  ;;  %v1401_v35 = vld [vmem:[#allocation8 + $0xd0] sm:$0xff] }
  0x4a   :  { %578 = vmatpush.bf16.msrb.mxu3 %v1118_v36  ;;  %v155_v34 = vperm.slane %v153_v32, 0  ;;  %v1391_v36 = vld [vmem:[#allocation8 + $0x80] sm:$0xff]  ;;  %v156_v39 = vperm.slane %v153_v32, 1  ;;  %v157_v56 = vperm.slane %v153_v32, 2  ;;  %v158_v61 = vperm.slane %v153_v32, 3 }
  0x4b   :  { %540 = vmatpush.bf16.msrb.mxu0 %v970_v41  ;;  %v1400_v41 = vld [vmem:[#allocation8 + $0xc8] sm:$0xff]  ;;  %v1399_v46 = vld [vmem:[#allocation8 + $0xc0] sm:$0xff] }
  0x4c   :  { %553 = vmatpush.bf16.msrb.mxu1 %v1098_v42 }
  0x4d   :  { %566 = vmatpush.bf16.msrb.mxu2 %v974_v43 }
  0x4e   :  { %579 = vmatpush.bf16.msrb.mxu3 %v1102_v47 }
  0x4f   :  { %541 = vmatpush.bf16.msrb.mxu0 %v954_v53 }
  0x50   :  { %554 = vmatpush.bf16.msrb.mxu1 %v1082_v54 }
  0x51   :  { %567 = vmatpush.bf16.msrb.mxu2 %v958_v55 }
  0x52   :  { %580 = vmatpush.bf16.msrb.mxu3 %v1086_v59 }
  0x53   :  { %542 = vmatpush.bf16.msrb.mxu0 %v938_v2 }
  0x54   :  { %555 = vmatpush.bf16.msrb.mxu1 %v1066_v3 }
  0x55   :  { %568 = vmatpush.bf16.msrb.mxu2 %v942_v5 }
  0x56   :  { %581 = vmatpush.bf16.msrb.mxu3 %v1070_v6  ;;  %543 = vmatmul.bf16.vlgmr.msrb.gmra.mxu0 %v1596_v62 }
  0x57   :  { %855 = vmatpush.bf16.msra.mxu0 %v1382_v7  ;;  %556 = vmatmul.bf16.vlgmr.msrb.gmra.mxu1 %v1598_v4 }
  0x58   :  { %868 = vmatpush.bf16.msra.mxu1 %v1390_v8  ;;  %569 = vmatmul.bf16.vlgmr.msrb.gmra.mxu2 %v1596_v62  ;;  %v1397_v62 = vld [vmem:[#allocation8 + $0xb0] sm:$0xff] }
  0x59   :  { %582 = vmatmul.bf16.vlgmr.msrb.gmra.mxu3 %v1598_v4  ;;  %881 = vmatpush.bf16.msra.mxu2 %v1398_v9  ;;  %v1376_v4 = vld [vmem:[#allocation8 + $0x8] sm:$0xff] }
  0x5a   :  { %894 = vmatpush.bf16.msra.mxu3 %v1406_v21 }
  0x5b   :  { %856 = vmatpush.bf16.msra.mxu0 %v1381_v10 }
  0x5c   :  { %869 = vmatpush.bf16.msra.mxu1 %v1389_v11 }
  0x5d   :  { %882 = vmatpush.bf16.msra.mxu2 %v1397_v62 }
  0x5e   :  { %895 = vmatpush.bf16.msra.mxu3 %v1405_v25 }
  0x5f   :  { %857 = vmatpush.bf16.msra.mxu0 %v1380_v12 }
  0x60   :  { %870 = vmatpush.bf16.msra.mxu1 %v1388_v13 }
  0x61   :  { %883 = vmatpush.bf16.msra.mxu2 %v1396_v22 }
  0x62   :  { %896 = vmatpush.bf16.msra.mxu3 %v1404_v27 }
  0x63   :  { %858 = vmatpush.bf16.msra.mxu0 %v1379_v14 }
  0x64   :  { %871 = vmatpush.bf16.msra.mxu1 %v1387_v15 }
  0x65   :  { %884 = vmatpush.bf16.msra.mxu2 %v1395_v26 }
  0x66   :  { %897 = vmatpush.bf16.msra.mxu3 %v1403_v29 }
  0x67   :  { %859 = vmatpush.bf16.msra.mxu0 %v1378_v16  ;;  %v1416_v16 = vld [vmem:[%s1618_s4] ss:$0 sm:$0xff] }
  0x68   :  { %872 = vmatpush.bf16.msra.mxu1 %v1386_v17 }
  0x69   :  { %885 = vmatpush.bf16.msra.mxu2 %v1394_v28 }
  0x6a   :  { %898 = vmatpush.bf16.msra.mxu3 %v1402_v31 }
  0x6b   :  { %860 = vmatpush.bf16.msra.mxu0 %v1377_v18 }
  0x6c   :  { %873 = vmatpush.bf16.msra.mxu1 %v1385_v19 }
  0x6d   :  { %886 = vmatpush.bf16.msra.mxu2 %v1393_v30 }
  0x6e   :  { %899 = vmatpush.bf16.msra.mxu3 %v1401_v35 }
  0x6f   :  { %861 = vmatpush.bf16.msra.mxu0 %v1376_v4 }
  0x70   :  { %874 = vmatpush.bf16.msra.mxu1 %v1384_v20 }
  0x71   :  { %887 = vmatpush.bf16.msra.mxu2 %v1392_v33 }
  0x72   :  { %900 = vmatpush.bf16.msra.mxu3 %v1400_v41 }
  0x73   :  { %862 = vmatpush.bf16.msra.mxu0 %v1375_v23 }
  0x74   :  { %875 = vmatpush.bf16.msra.mxu1 %v1383_v24 }
  0x75   :  { %888 = vmatpush.bf16.msra.mxu2 %v1391_v36 }
  0x76   :  { %901 = vmatpush.bf16.msra.mxu3 %v1399_v46 }
  0xb3   :  { %v492_v37 = vpop.f32.mrf.mxu0 }
  0xb4   :  { %v493_v38 = vadd.f32 %v492_v37, %v155_v34  ;;  %v505_v40 = vpop.f32.mrf.mxu1 }
  0xb6   :  { %v506_v42 = vadd.f32 %v505_v40, %v493_v38 }
  0xb8   :  { %v587_v45 = vmax.f32 %v506_v42, 0.0 }
  0xba   :  { %v591_v47 = vpack.c.bf16 %v587_v45, %v587_v45 }
  0xbb   :  { %v518_v43 = vpop.f32.mrf.mxu2  ;;  %v494_v50 = vpop.f32.mrf.mxu0 }
  0xbc   :  { %v519_v44 = vadd.f32 %v518_v43, %v156_v39  ;;  %v531_v48 = vpop.f32.mrf.mxu3  ;;  %863 = vmatmul.bf16.vlgmr.msra.gmra.mxu0 %v591_v47  ;;  %v507_v51 = vpop.f32.mrf.mxu1 }
  0xbe   :  { %v532_v49 = vadd.f32 %v531_v48, %v519_v44 }
  0xc0   :  { %v588_v52 = vmax.f32 %v532_v49, 0.0 }
  0xc2   :  { %v592_v53 = vpack.c.bf16 %v588_v52, %v588_v52 }
  0xc3   :  { %v520_v54 = vpop.f32.mrf.mxu2 }
  0xc4   :  { %876 = vmatmul.bf16.vlgmr.msra.gmra.mxu1 %v592_v53  ;;  %v533_v55 = vpop.f32.mrf.mxu3 }
  0xd3   :  { %v544_v57 = vpop.f32.mrf.mxu0 }
  0xd4   :  { %v545_v58 = vadd.f32 %v544_v57, %v157_v56  ;;  %v557_v59 = vpop.f32.mrf.mxu1 }
  0xd6   :  { %v558_v60 = vadd.f32 %v557_v59, %v545_v58 }
  0xd8   :  { %v589_v63 = vmax.f32 %v558_v60, 0.0 }
  0xda   :  { %v593_v0 = vpack.c.bf16 %v589_v63, %v589_v63 }
  0xdb   :  { %v570_v1 = vpop.f32.mrf.mxu2  ;;  %v546_v5 = vpop.f32.mrf.mxu0 }
  0xdc   :  { %v571_v2 = vadd.f32 %v570_v1, %v158_v61  ;;  %v583_v3 = vpop.f32.mrf.mxu3  ;;  %v559_v6 = vpop.f32.mrf.mxu1  ;;  %889 = vmatmul.bf16.vlgmr.msra.gmra.mxu2 %v593_v0 }
  0xde   :  { %v584_v7 = vadd.f32 %v583_v3, %v571_v2 }
  0xe0   :  { %v590_v8 = vmax.f32 %v584_v7, 0.0 }
  0xe2   :  { %v594_v9 = vpack.c.bf16 %v590_v8, %v590_v8 }
  0xe3   :  { %v572_v10 = vpop.f32.mrf.mxu2 }
  0xe4   :  { %v585_v11 = vpop.f32.mrf.mxu3  ;;  %902 = vmatmul.bf16.vlgmr.msra.gmra.mxu3 %v594_v9 }
 0x139   :  { %v864_v12 = vpop.f32.mrf.mxu0 }
 0x13a   :  { %v865_v17 = vadd.f32 %v1416_v16, %v864_v12 }
 0x141   :  { %v877_v13 = vpop.f32.mrf.mxu1  ;;  %v866_v14 = vpop.f32.mrf.mxu0 }
 0x142   :  { %v878_v19 = vadd.f32 %v877_v13, %v865_v17 }
 0x149   :  { %v879_v15 = vpop.f32.mrf.mxu1 }
 0x15f   :  { %v890_v18 = vpop.f32.mrf.mxu2 }
 0x160   :  { %v891_v62 = vadd.f32 %v890_v18, %v878_v19 }
 0x167   :  { %v903_v4 = vpop.f32.mrf.mxu3  ;;  %v892_v21 = vpop.f32.mrf.mxu2 }
 0x168   :  { %v904_v20 = vadd.f32 %v903_v4, %v891_v62 }
 0x16a   :  { %907 = vst [vmem:[#allocation10] sm:$0x3] %v904_v20 }
 0x16b   :  { %918 = dma.vmem_to_hbm [thread:$0]  %s914_s16, 32, %s916_s19, [#allocation4]  }
 0x16f   :  { %v905_v22 = vpop.f32.mrf.mxu3 }
 0x170   :  { %1543 = dma.done.wait [#allocation4], 32  }
 0x171   :  { %1544 = vsyncadd [#allocation4], 4294967264 }
 0x172   :  { %923 = vsyncpa [#allocation3], 1 }
 0x173   :  { %924 = vsyncpa [#allocation6], 1 }
 0x174   :  { %925 = vsyncpa [#allocation9], 1 }
 0x175   :  { %926 = vsyncpa [#allocation4], 1 }

</bundles_post_ra>
